<compile_context>
chip_gen: v7x
topology: tpu7x:2x2x1
jax: 0.10.0
libtpu: 0.0.40
codegen_flags: <defaults>
</compile_context>

<pallas_src>
import functools

import jax
import jax.numpy as jnp
from jax.experimental import pallas as pl
from jax.experimental.pallas import tpu as pltpu

LANE = 128


def relunet_kernel(x_ref, w1_ref, b1_ref, w2_ref, b2_ref, w3_ref, b3_ref, o_ref,
                   *, use_bf16_matmul=False):
    # x tile: (1, tm), batch on the lane axis.
    x = x_ref[...].astype(jnp.float32)

    # Layer 1 (in_features=1): degenerate K=1 matmul -> VPU broadcast outer product.
    h = jnp.maximum(w1_ref[...] * x + b1_ref[...], 0.0)          # (H,1)*(1,tm)+(H,1) -> (H,tm)

    # Layer 2 (H x H): MXU matmul, f32 accumulation.
    w2 = w2_ref[...]
    if use_bf16_matmul:                       # static; only enabled for non-toy H
        w2 = w2.astype(jnp.bfloat16)
        h = h.astype(jnp.bfloat16)
    h = jnp.dot(w2, h, preferred_element_type=jnp.float32) + b2_ref[...]
    h = jnp.maximum(h, 0.0)                                      # (H, tm) f32

    # Layer 3 (out_features=1): also on the MXU (frees VALU/XLU bundle slots).
    o = jnp.dot(w3_ref[...], h, preferred_element_type=jnp.float32) + b3_ref[0]
    o_ref[...] = jnp.maximum(o, 0.0).astype(o_ref.dtype)         # ReLU, lane-dense store


def _round_up(n, m):
    return ((n + m - 1) // m) * m


def _choose_tm(B, H):
    """Pick a lane-aligned batch tile (see perf notes at top of file)."""
    if B <= LANE:
        return B                                  # single tiny step; block == full array
    # v5e's default scoped VMEM is 16 MiB: keep ~4 live (H, tm) f32 temporaries plus
    # the 8-sublane-padded multi-buffered (1, tm) x/out tiles under ~12 MiB.
    bytes_per_batch_col = 4 * (4 * H) + 6 * (4 * 8)
    tm_vmem = max(LANE, (12 * 1024 * 1024 // bytes_per_batch_col) // LANE * LANE)
    target = 2048                                 # amortizes ~0.35 us/step grid overhead
    half = _round_up((B + 1) // 2, LANE)          # >=2 "parallel" steps -> both v7x TCs busy
    return max(LANE, min(target, tm_vmem, half))


@functools.partial(jax.jit, static_argnums=(2,))
def _relunet_forward(x, params, tm):
    B = x.shape[0]
    H = params["w1"].shape[0]

    grid_b = (B + tm - 1) // tm
    B_pad = grid_b * tm

    # (B, 1) and (1, B) share the same element order -> free reshape; zero-pad the
    # batch (lane) axis up to a multiple of the tile and slice the result back.
    x_t = x.reshape(1, B)
    if B_pad != B:
        x_t = jnp.pad(x_t, ((0, 0), (0, B_pad - B)))

    # Deeper pipelining for the small streaming x/out tiles on multi-step grids.
    io_mode = pl.Buffered(min(3, grid_b)) if grid_b > 1 else None
    # Resident weights: single-buffer only when H is big enough for VMEM to matter.
    w_mode = pl.Buffered(1) if H >= 1024 else None
    use_bf16 = H >= 256                           # bf16 MXU inputs only for non-toy H

    def full(shape):                              # grid-resident weight block
        return pl.BlockSpec(shape, lambda i: (0, 0), pipeline_mode=w_mode)

    cost = pl.CostEstimate(
        flops=2 * H * (H + 2) * B_pad,
        transcendentals=0,
        bytes_accessed=8 * B_pad + 4 * (H * H + 4 * H + 1),
    )

    out_t = pl.pallas_call(
        functools.partial(relunet_kernel, use_bf16_matmul=use_bf16),
        out_shape=jax.ShapeDtypeStruct((1, B_pad), x.dtype),
        grid=(grid_b,),
        in_specs=[
            pl.BlockSpec((1, tm), lambda i: (0, i), pipeline_mode=io_mode),   # x tile
            full((H, 1)),                                                     # w1
            full((H, 1)),                                                     # b1
            full((H, H)),                                                     # w2
            full((H, 1)),                                                     # b2
            full((1, H)),                                                     # w3
            pl.BlockSpec(memory_space=pltpu.MemorySpace.SMEM),                # b3 scalar
        ],
        out_specs=pl.BlockSpec((1, tm), lambda i: (0, i), pipeline_mode=io_mode),
        compiler_params=pltpu.CompilerParams(
            dimension_semantics=("parallel",),    # batch axis -> megacore / v7x TC sharding
        ),
        cost_estimate=cost,
    )(x_t, params["w1"], params["b1"], params["w2"], params["b2"],
      params["w3"], params["b3"])

    return out_t[:, :B].reshape(B, 1)


def relunet_forward(x, params, *, tm=None):
    """x: (B, 1) float32 (PyTorch convention).  params: dict of w1,b1,w2,b2,w3,b3."""
    B, one = x.shape
    assert one == 1, "ReLUNet expects in_features == 1"
    H = params["w1"].shape[0]
    if tm is None:
        tm = _choose_tm(B, H)
    else:
        assert tm == B or tm % LANE == 0, "explicit batch tile must be lane-aligned"
    return _relunet_forward(x, params, tm)


def init_params(key, hidden=32):
    """Deterministic init mimicking nn.Linear's U(-1/sqrt(fan_in), 1/sqrt(fan_in))."""
    def linear(k, fan_in, fan_out):
        kw, kb = jax.random.split(k)
        bound = 1.0 / jnp.sqrt(jnp.float32(fan_in))
        w = jax.random.uniform(kw, (fan_out, fan_in), jnp.float32, -bound, bound)
        b = jax.random.uniform(kb, (fan_out,), jnp.float32, -bound, bound)
        return w, b

    k1, k2, k3 = jax.random.split(key, 3)
    W1, b1 = linear(k1, 1, hidden)        # (H,1), (H,)
    W2, b2 = linear(k2, hidden, hidden)   # (H,H), (H,)
    W3, b3 = linear(k3, hidden, 1)        # (1,H), (1,)
    return {
        "w1": W1,                         # (H, 1)
        "b1": b1.reshape(hidden, 1),      # (H, 1)
        "w2": W2,                         # (H, H) [out, in]
        "b2": b2.reshape(hidden, 1),      # (H, 1)
        "w3": W3,                         # (1, H) [out, in]  (fed straight to the MXU)
        "b3": b3,                         # (1,)   scalar, kept in SMEM
    }


def relunet_reference(x, p):
    """Pure-JAX reference matching PyTorch semantics (x: (B,1))."""
    h = jnp.maximum(x @ p["w1"].T + p["b1"].T, 0.0)
    h = jnp.maximum(h @ p["w2"].T + p["b2"].T, 0.0)
    return jnp.maximum(h @ p["w3"].T + p["b3"], 0.0)


if __name__ == "__main__":
    key = jax.random.PRNGKey(0)
    kx, kp = jax.random.split(key)

    H = 32
    params = init_params(kp, hidden=H)

    def check(B):
        xk = jax.random.fold_in(kx, B)
        x = jax.random.normal(xk, (B, 1), jnp.float32)
        out = jax.block_until_ready(relunet_forward(x, params))
        ref = relunet_reference(x, params)
        assert out.shape == (B, 1)
        assert jnp.allclose(out, ref, atol=1e-5, rtol=1e-5), f"mismatch vs. reference (B={B})"

    check(128)    # single grid step (tm = B), same path as the original kernel
    check(300)    # tm=256: 2 "parallel" steps + batch padding (B_pad=512)
    check(4608)   # tm=2048: 3 steps, Buffered(3) x/out pipeline, padding (B_pad=6144)

    print("KERNEL_OK")
</pallas_src>

<mosaic_0001>
module attributes {stable_mosaic.version = 11 : i64} {
  func.func @relunet_kernel(%arg0: i32, %arg1: memref<1x128xf32, #tpu.memory_space<vmem>>, %arg2: memref<32x1xf32, #tpu.memory_space<vmem>>, %arg3: memref<32x1xf32, #tpu.memory_space<vmem>>, %arg4: memref<32x32xf32, #tpu.memory_space<vmem>>, %arg5: memref<32x1xf32, #tpu.memory_space<vmem>>, %arg6: memref<1x32xf32, #tpu.memory_space<vmem>>, %arg7: memref<1xf32, #tpu.memory_space<smem>>, %arg8: memref<1x128xf32, #tpu.memory_space<vmem>>) attributes {dimension_semantics = [#tpu.dimension_semantics<parallel>], iteration_bounds = array<i64: 1>, scalar_prefetch = 0 : i64, scratch_operands = 0 : i64, tpu.core_type = #tpu.core_type<tc>, window_params = [{transform_indices = @transform_0, window_bounds = array<i64: 1, 128>}, {pipeline_mode = #tpu.pipeline_mode<synchronous>, transform_indices = @transform_1, window_bounds = array<i64: 32, 1>}, {pipeline_mode = #tpu.pipeline_mode<synchronous>, transform_indices = @transform_2, window_bounds = array<i64: 32, 1>}, {pipeline_mode = #tpu.pipeline_mode<synchronous>, transform_indices = @transform_3, window_bounds = array<i64: 32, 32>}, {pipeline_mode = #tpu.pipeline_mode<synchronous>, transform_indices = @transform_4, window_bounds = array<i64: 32, 1>}, {pipeline_mode = #tpu.pipeline_mode<synchronous>, transform_indices = @transform_5, window_bounds = array<i64: 1, 32>}, {transform_indices = @transform_6, window_bounds = array<i64: 1>}, {transform_indices = @transform_7, window_bounds = array<i64: 1, 128>}]} {
    %c0 = arith.constant 0 : index
    %c0_0 = arith.constant 0 : index
    %0 = vector.load %arg1[%c0, %c0_0] : memref<1x128xf32, #tpu.memory_space<vmem>>, vector<1x128xf32>
    %c0_1 = arith.constant 0 : index
    %c0_2 = arith.constant 0 : index
    %1 = vector.load %arg2[%c0_1, %c0_2] : memref<32x1xf32, #tpu.memory_space<vmem>>, vector<32x1xf32>
    %2 = vector.broadcast %1 : vector<32x1xf32> to vector<32x128xf32>
    %3 = vector.broadcast %0 : vector<1x128xf32> to vector<32x128xf32>
    %4 = arith.mulf %2, %3 : vector<32x128xf32>
    %c0_3 = arith.constant 0 : index
    %c0_4 = arith.constant 0 : index
    %5 = vector.load %arg3[%c0_3, %c0_4] : memref<32x1xf32, #tpu.memory_space<vmem>>, vector<32x1xf32>
    %6 = vector.broadcast %5 : vector<32x1xf32> to vector<32x128xf32>
    %7 = arith.addf %4, %6 : vector<32x128xf32>
    %cst = arith.constant 0.000000e+00 : f32
    %8 = vector.broadcast %cst : f32 to vector<32x128xf32>
    %9 = arith.maximumf %7, %8 : vector<32x128xf32>
    %c0_5 = arith.constant 0 : index
    %c0_6 = arith.constant 0 : index
    %10 = vector.load %arg4[%c0_5, %c0_6] : memref<32x32xf32, #tpu.memory_space<vmem>>, vector<32x32xf32>
    %cst_7 = arith.constant dense<0.000000e+00> : vector<32x128xf32>
    %11 = tpu.matmul %10, %9, %cst_7 {dimension_numbers = #tpu.dot_dimension_numbers<[1], [0], [0], [1], [0, 0, 1, 1], [], []>} : vector<32x32xf32>, vector<32x128xf32>, vector<32x128xf32> -> vector<32x128xf32>
    %c0_8 = arith.constant 0 : index
    %c0_9 = arith.constant 0 : index
    %12 = vector.load %arg5[%c0_8, %c0_9] : memref<32x1xf32, #tpu.memory_space<vmem>>, vector<32x1xf32>
    %13 = vector.broadcast %12 : vector<32x1xf32> to vector<32x128xf32>
    %14 = arith.addf %11, %13 : vector<32x128xf32>
    %cst_10 = arith.constant 0.000000e+00 : f32
    %15 = vector.broadcast %cst_10 : f32 to vector<32x128xf32>
    %16 = arith.maximumf %14, %15 : vector<32x128xf32>
    %c0_11 = arith.constant 0 : index
    %c0_12 = arith.constant 0 : index
    %17 = vector.load %arg6[%c0_11, %c0_12] : memref<1x32xf32, #tpu.memory_space<vmem>>, vector<1x32xf32>
    %cst_13 = arith.constant dense<0.000000e+00> : vector<1x128xf32>
    %18 = tpu.matmul %17, %16, %cst_13 {dimension_numbers = #tpu.dot_dimension_numbers<[1], [0], [0], [1], [0, 0, 1, 1], [], []>} : vector<1x32xf32>, vector<32x128xf32>, vector<1x128xf32> -> vector<1x128xf32>
    %c0_14 = arith.constant 0 : index
    %19 = memref.load %arg7[%c0_14] : memref<1xf32, #tpu.memory_space<smem>>
    %20 = vector.broadcast %19 : f32 to vector<1x128xf32>
    %21 = arith.addf %18, %20 : vector<1x128xf32>
    %cst_15 = arith.constant 0.000000e+00 : f32
    %22 = vector.broadcast %cst_15 : f32 to vector<1x128xf32>
    %23 = arith.maximumf %21, %22 : vector<1x128xf32>
    %c0_16 = arith.constant 0 : index
    %c0_17 = arith.constant 0 : index
    %24 = vector.load %arg8[%c0_16, %c0_17] : memref<1x128xf32, #tpu.memory_space<vmem>>, vector<1x128xf32>
    tpu.vector_store %arg8[%c0_16, %c0_17], %23 {strides = array<i32>} : memref<1x128xf32, #tpu.memory_space<vmem>>, vector<1x128xf32>,
    return
  }
  func.func @transform_0(%arg0: i32) -> (i32, i32) {
    %c0_i32 = arith.constant 0 : i32
    %c0_i32_0 = arith.constant 0 : i32
    return %c0_i32, %arg0 : i32, i32
  }
  func.func @transform_1(%arg0: i32) -> (i32, i32) {
    %c0_i32 = arith.constant 0 : i32
    %c0_i32_0 = arith.constant 0 : i32
    %c0_i32_1 = arith.constant 0 : i32
    return %c0_i32, %c0_i32_0 : i32, i32
  }
  func.func @transform_2(%arg0: i32) -> (i32, i32) {
    %c0_i32 = arith.constant 0 : i32
    %c0_i32_0 = arith.constant 0 : i32
    %c0_i32_1 = arith.constant 0 : i32
    return %c0_i32, %c0_i32_0 : i32, i32
  }
  func.func @transform_3(%arg0: i32) -> (i32, i32) {
    %c0_i32 = arith.constant 0 : i32
    %c0_i32_0 = arith.constant 0 : i32
    %c0_i32_1 = arith.constant 0 : i32
    return %c0_i32, %c0_i32_0 : i32, i32
  }
  func.func @transform_4(%arg0: i32) -> (i32, i32) {
    %c0_i32 = arith.constant 0 : i32
    %c0_i32_0 = arith.constant 0 : i32
    %c0_i32_1 = arith.constant 0 : i32
    return %c0_i32, %c0_i32_0 : i32, i32
  }
  func.func @transform_5(%arg0: i32) -> (i32, i32) {
    %c0_i32 = arith.constant 0 : i32
    %c0_i32_0 = arith.constant 0 : i32
    %c0_i32_1 = arith.constant 0 : i32
    return %c0_i32, %c0_i32_0 : i32, i32
  }
  func.func @transform_6(%arg0: i32) -> i32 {
    %c0_i32 = arith.constant 0 : i32
    %c0_i32_0 = arith.constant 0 : i32
    return %c0_i32 : i32
  }
  func.func @transform_7(%arg0: i32) -> (i32, i32) {
    %c0_i32 = arith.constant 0 : i32
    %c0_i32_0 = arith.constant 0 : i32
    return %c0_i32, %arg0 : i32, i32
  }
}

</mosaic_0001>

<bundles_post_ra>
// kernel: _relunet_forward.1
= control target key start
LH: loop header
LB: loop body
LE: loop exit
PB: predicated region body
PF: predicated region fallthrough
CT: control target
= control target key end

     0   :  { %v406_v2 = vmov 0   ;;  %s525_s0 = inlined_call_operand.vmem [shape: f32[1,128], index: 0, kind: input, shape index: {}]   ;;  %s526_s1 = inlined_call_operand.vmem [shape: f32[32,1], index: 1, kind: input, shape index: {}]   ;;  %s527_s2 = inlined_call_operand.vmem [shape: f32[32,1], index: 2, kind: input, shape index: {}]   ;;  %s528_s3 = inlined_call_operand.vmem [shape: f32[32,32], index: 3, kind: input, shape index: {}]   ;;  %s529_s4 = inlined_call_operand.vmem [shape: f32[32,1], index: 4, kind: input, shape index: {}]   ;;  %s530_s5 = inlined_call_operand.vmem [shape: f32[1,32], index: 5, kind: input, shape index: {}]   ;;  %s531_s6 = inlined_call_operand.<no memory space> [shape: f32[1], index: 6, kind: input, shape index: {}]   ;;  %s532_s7 = inlined_call_operand.hbm [shape: f32[1,128], index: 7, kind: output, shape index: {}]  }
   0x1   :  { %v63_v0 = vld [vmem:[%s527_s2] sm:$0xff]  ;;  %381 = vset.pattern.permute.xlu1 %v406_v2  ;;  %380 = vset.pattern.permute.xlu0 %v406_v2  ;;  %v64_v3 = vld [vmem:[%s527_s2 + $0x8] sm:$0xff] }
   0x2   :  { %v29_v1 = vld [vmem:[%s526_s1] sm:$0xff]  ;;  %69 = vperm.xlu1 %381, %v63_v0   ;;  %v30_v4 = vld [vmem:[%s526_s1 + $0x8] sm:$0xff] }
   0x3   :  { %35 = vperm.xlu0 %380, %v29_v1  }
   0x4   :  { %13 = vsyncpa [#allocation4], 0  ;;  %v32_v5 = vld [vmem:[%s526_s1 + $0x18] sm:$0xff]  ;;  %v31_v6 = vld [vmem:[%s526_s1 + $0x10] sm:$0xff]  ;;  %vm123_vm0 = vcmask 261120   ;;  %v407_v40 = vmov 0.0|0.0   ;;  %v227_v61 = vstv %s531_s6 }
   0x5   :  { %v66_v7 = vld [vmem:[%s527_s2 + $0x18] sm:$0xff]  ;;  %v65_v8 = vld [vmem:[%s527_s2 + $0x10] sm:$0xff]  ;;  %v100_v9 = vld [vmem:[%s529_s4 + $0x8] sm:$0xff]  ;;  %369 = vmatprep.subr.bf16.mxu1 %v407_v40  ;;  %vm408_vm1 = vmmov 0   ;;  %v409_v41 = vmov 0.0   ;;  %s410_s11 = smov [#allocation3]  }
   0x6   :  { %74 = vperm.xlu1 %381, %v64_v3   ;;  %v99_v10 = vld [vmem:[%s529_s4] sm:$0xff]  ;;  %v102_v11 = vld [vmem:[%s529_s4 + $0x18] sm:$0xff]  ;;  %v101_v12 = vld [vmem:[%s529_s4 + $0x10] sm:$0xff]  ;;  %358 = vmatprep.mubr.msk.f32.mxu1 %vm408_vm1, %v409_v41  ;;  %s309_s12 = sshll.u32 %s410_s11, 4  ;;  %s310_s12 = int_to_ptr.vmem [resolvable:$true] %s309_s12 }
   0x7   :  { %40 = vperm.xlu0 %380, %v30_v4   ;;  %v95_v13 = vld [vmem:[%s528_s3] sm:$0xff]  ;;  %v96_v37 = vld [vmem:[%s528_s3 + $0x8] sm:$0xff]  ;;  %v97_v38 = vld [vmem:[%s528_s3 + $0x10] sm:$0xff]  ;;  %s382_s13 = scalar_lea.vmem %s310_s12, 16  ;;  %s386_s14 = scalar_lea.vmem %s310_s12, 32 }
   0x8   :  { %344 = vmatprep.mubr.msk.f32.mxu0 %vm123_vm0, %v95_v13  ;;  %v317_v14 = vld [vmem:[%s525_s0] ss:$0 sm:$0xff]  ;;  %v98_v39 = vld [vmem:[%s528_s3 + $0x18] sm:$0xff]  ;;  %p383_p0 = scmp.ne.s32.totalorder %s310_s12, %s382_s13  ;;  %p387_p1 = scmp.lt.s32.totalorder %s310_s12, %s310_s12 }
   0x9   :  { %v225_v60 = vld [vmem:[%s530_s5] sm:$0x1]  ;;  %p388_p2 = scmp.lt.s32.totalorder %s386_s14, %s382_s13 }
   0xa   :  { %50 = vperm.xlu1 %381, %v32_v5  }
   0xb   :  { %45 = vperm.xlu0 %380, %v31_v6   ;;  %p389_p3 = por %p388_p2, %p387_p1 }
   0xd   :  { %p390_p4 = pnand %p389_p3, %p383_p0 }
   0xe   :  { %84 = vperm.xlu1 %381, %v66_v7  }
   0xf   :  { %79 = vperm.xlu0 %380, %v65_v8  }
  0x12   :  { %110 = vperm.xlu1 %381, %v100_v9  }
  0x13   :  { %105 = vperm.xlu0 %380, %v99_v10  }
  0x16   :  { %120 = vperm.xlu1 %381, %v102_v11  }
  0x17   :  { %115 = vperm.xlu0 %380, %v101_v12  }
  0x81   :  { %v70_v15 = vpop.permute.xlu1 %69 }
  0x82   :  { %v36_v16 = vpop.permute.xlu0 %35 }
  0x83   :  { %v59_v17 = vmul.f32 %v317_v14, %v36_v16 }
  0x85   :  { %v75_v18 = vpop.permute.xlu1 %74  ;;  %v87_v20 = vadd.f32 %v70_v15, %v59_v17 }
  0x86   :  { %v41_v19 = vpop.permute.xlu0 %40 }
  0x87   :  { %v60_v21 = vmul.f32 %v317_v14, %v41_v19  ;;  %v91_v25 = vmax.f32 %v87_v20, 0.0 }
  0x89   :  { %v88_v22 = vadd.f32 %v75_v18, %v60_v21  ;;  %v51_v23 = vpop.permute.xlu1 %50 }
  0x8a   :  { %v46_v24 = vpop.permute.xlu0 %45  ;;  %v62_v27 = vmul.f32 %v317_v14, %v51_v23 }
  0x8b   :  { %v92_v26 = vmax.f32 %v88_v22, 0.0  ;;  %v61_v28 = vmul.f32 %v317_v14, %v46_v24 }
  0x8d   :  { %v361_v29 = vpack.c.bf16 %v92_v26, %v91_v25  ;;  %v85_v30 = vpop.permute.xlu1 %84 }
  0x8e   :  { %v80_v31 = vpop.permute.xlu0 %79  ;;  %v90_v32 = vadd.f32 %v85_v30, %v62_v27 }
  0x8f   :  { %v89_v33 = vadd.f32 %v80_v31, %v61_v28  ;;  %362 = vmatprep.subr.bf16.mxu0 %v361_v29 }
  0x90   :  { %364 = vmatpush3.bf16.msra.mxu0 %v361_v29  ;;  %v94_v34 = vmax.f32 %v90_v32, 0.0 }
  0x91   :  { %v93_v35 = vmax.f32 %v89_v33, 0.0  ;;  %v111_v42 = vpop.permute.xlu1 %110 }
  0x92   :  { %v106_v43 = vpop.permute.xlu0 %105 }
  0x93   :  { %v365_v36 = vpack.c.bf16 %v94_v34, %v93_v35 }
  0x95   :  { %366 = vmatprep.subr.bf16.mxu0 %v365_v36  ;;  %v121_v49 = vpop.permute.xlu1 %120 }
  0x96   :  { %368 = vmatpush3.bf16.msra.mxu0 %v365_v36  ;;  %v116_v52 = vpop.permute.xlu0 %115 }
  0x99   :  { %345 = vmatmul.mubr.msk.f32.vlgmr.msra.gmra.mrb[0].mxu0 %vm123_vm0, %v96_v37 }
  0x9a   :  { %347 = vmatprep.mubr.msk.f32.mxu0 %vm123_vm0, %v97_v38 }
  0x9d   :  { %348 = vmatmul.mubr.msk.f32.gmra.mrb[2].mxu0 %vm123_vm0, %v98_v39 }
 0x16c   :  { %v346_v44 = vpop.f32.mrb[0].mxu0 }
 0x16d   :  { %v208_v45 = vadd.f32 %v346_v44, %v111_v42  ;;  %v202_v46 = vpop.f32.mrb[1].mxu0 }
 0x16e   :  { %v203_v47 = vadd.f32 %v202_v46, %v106_v43 }
 0x16f   :  { %v222_v48 = vmax.f32 %v208_v45, 0.0 }
 0x170   :  { %v221_v50 = vmax.f32 %v203_v47, 0.0  ;;  %v349_v51 = vpop.f32.mrb[2].mxu0 }
 0x171   :  { %v218_v53 = vadd.f32 %v349_v51, %v121_v49  ;;  %v212_v54 = vpop.f32.mrb[3].mxu0 }
 0x172   :  { %v213_v55 = vadd.f32 %v212_v54, %v116_v52  ;;  %v370_v56 = vpack.c.bf16 %v222_v48, %v221_v50 }
 0x173   :  { %v224_v57 = vmax.f32 %v218_v53, 0.0 }
 0x174   :  { %v223_v58 = vmax.f32 %v213_v55, 0.0  ;;  %371 = vmatpush3.bf16.msra.mxu1 %v370_v56 }
 0x175   :  { %372 = vmatprep.subr.bf16.mxu1 %v407_v40 }
 0x176   :  { %v373_v59 = vpack.c.bf16 %v224_v57, %v223_v58 }
 0x178   :  { %374 = vmatpush3.bf16.msra.mxu1 %v373_v59 }
 0x17b   :  { %359 = vmatmul.mubr.msk.f32.vlgmr.msra.gmra.mrb[0].mxu1 %vm123_vm0, %v225_v60 }
 0x24e   :  { %v297_v62 = vpop.f32.mrb[0].mxu1 }
 0x24f   :  { %v298_v63 = vadd.f32 %v297_v62, %v227_v61  ;;  %v360_v0 = vpop.f32.mrb[1].mxu1 }
 0x251   :  { %v301_v1 = vmax.f32 %v298_v63, 0.0 }
 0x253   :  { %302 = vst [vmem:[#allocation3] sm:$0x1] %v301_v1 }
 0x254   :  { %393 = shalt.err (!%p390_p4)
}
 0x255   :  { %s394_s6 = scalar_lea.hbm %s532_s7, 16 }
 0x256   :  { %p395_p5 = scmp.ne.s32.totalorder %s532_s7, %s394_s6  ;;  %p398_p6 = scmp.lt.u32.totalorder %s394_s6, %s532_s7 }
 0x258   :  { %p400_p7 = pnand %p398_p6, %p395_p5 }
 0x25a   :  { %403 = shalt.err (!%p400_p7)
}
 0x25b   :  { %312 = dma.vmem_to_hbm [thread:$0]  %s310_s12, 16, %s532_s7, [#allocation4]  }
 0x25c   :  { %404 = dma.done.wait [#allocation4], 16  }
 0x25d   :  { %405 = vsyncadd [#allocation4], 4294967280 }
 0x25e   :  { %316 = vsyncpa [#allocation4], 1 }

</bundles_post_ra>
